<compile_context>
chip_gen: v6e
topology: v6e:2x2x1
jax: 0.10.0
libtpu: 0.0.40
codegen_flags: <defaults>
</compile_context>

<pallas_src>
import jax
import jax.numpy as jnp
from jax.experimental import pallas as pl
from jax.experimental.pallas import tpu as pltpu

_LANE = 128
_SUBLANE = 8
_H1 = 64   # hidden width 1 (fixed by the module)
_H2 = 32   # hidden width 2 (fixed by the module)


def _round_up(x, m):
    return (x + m - 1) // m * m


def _mlp_kernel(x_ref, w1_ref, b1_ref, w2_ref, b2_ref, w3_ref, b3_ref, o_ref):
    """Fused Linear->ReLU->(Dropout=id)->Linear->ReLU->Linear on one batch tile."""
    # Layer 1: bf16 MXU matmul, f32 accumulate, f32 bias + ReLU.
    h1 = jnp.dot(x_ref[...], w1_ref[...], preferred_element_type=jnp.float32)
    h1 = jnp.maximum(h1 + b1_ref[...], 0.0)
    # Dropout(0.2) == identity in eval/inference mode.
    # Layer 2
    h2 = jnp.dot(h1.astype(w2_ref.dtype), w2_ref[...],
                 preferred_element_type=jnp.float32)
    h2 = jnp.maximum(h2 + b2_ref[...], 0.0)
    # Layer 3: logits, lane-padded to 128 for dense stores.
    out = jnp.dot(h2.astype(w3_ref.dtype), w3_ref[...],
                  preferred_element_type=jnp.float32)
    o_ref[...] = (out + b3_ref[...]).astype(o_ref.dtype)


def _choose_tile_b(batch, d, out_pad, vmem_budget_bytes=24 * 1024 * 1024):
    """Largest sublane-aligned batch tile fitting a per-generation-safe budget."""
    # Per row: double-buffered bf16 x tile + double-buffered f32 padded output.
    per_row = 2 * d * 2 + 2 * out_pad * 4
    tile = vmem_budget_bytes // max(per_row, 1)
    tile = max(_SUBLANE, (min(tile, 1024) // _SUBLANE) * _SUBLANE)
    return min(tile, _round_up(batch, _SUBLANE))


def crisis_classifier_forward(x, params):
    """x: (B, embedding_dim) float32. params: pre-transposed (in, out) weights."""
    B, D = x.shape
    num_out = params["w3"].shape[1]
    out_pad = _round_up(num_out, _LANE)

    tile_b = _choose_tile_b(B, D, out_pad)
    b_pad = _round_up(B, tile_b)
    grid = (b_pad // tile_b,)

    # bf16 inputs/weights (halves bytes streamed from HBM); biases stay f32.
    x_bf = x.astype(jnp.bfloat16)
    if b_pad != B:
        x_bf = jnp.pad(x_bf, ((0, b_pad - B), (0, 0)))
    w1 = params["w1"].astype(jnp.bfloat16)
    w2 = params["w2"].astype(jnp.bfloat16)
    w3 = jnp.pad(params["w3"], ((0, 0), (0, out_pad - num_out))).astype(jnp.bfloat16)
    b1 = params["b1"]
    b2 = params["b2"]
    b3 = jnp.pad(params["b3"], ((0, 0), (0, out_pad - num_out)))

    const = lambda i: (0, 0)  # weights/biases: same block every grid step

    flops = 2 * b_pad * (D * _H1 + _H1 * _H2 + _H2 * out_pad)
    bytes_accessed = (
        x_bf.size * 2 + w1.size * 2 + w2.size * 2 + w3.size * 2
        + (b1.size + b2.size + b3.size) * 4 + b_pad * out_pad * 4
    )

    out = pl.pallas_call(
        _mlp_kernel,
        out_shape=jax.ShapeDtypeStruct((b_pad, out_pad), jnp.float32),
        grid=grid,
        in_specs=[
            pl.BlockSpec((tile_b, D), lambda i: (i, 0)),   # streamed batch tiles
            pl.BlockSpec((D, _H1), const),                 # VMEM-resident weights
            pl.BlockSpec((1, _H1), const),
            pl.BlockSpec((_H1, _H2), const),
            pl.BlockSpec((1, _H2), const),
            pl.BlockSpec((_H2, out_pad), const),
            pl.BlockSpec((1, out_pad), const),
        ],
        out_specs=pl.BlockSpec((tile_b, out_pad), lambda i: (i, 0)),
        compiler_params=pltpu.CompilerParams(
            dimension_semantics=("parallel",),       # megacore on v7x, no-op elsewhere
            vmem_limit_bytes=64 * 1024 * 1024,
        ),
        cost_estimate=pl.CostEstimate(
            flops=flops, bytes_accessed=bytes_accessed, transcendentals=0
        ),
    )(x_bf, w1, b1, w2, b2, w3, b3)

    return out[:B, :num_out]


def init_params(key, embedding_dim, num_crisis_types):
    """Xavier-uniform weights ((in, out) layout), zero biases."""
    dims = [(embedding_dim, _H1), (_H1, _H2), (_H2, num_crisis_types)]
    keys = jax.random.split(key, len(dims))
    params = {}
    for i, ((fan_in, fan_out), k) in enumerate(zip(dims, keys), start=1):
        bound = (6.0 / (fan_in + fan_out)) ** 0.5
        params[f"w{i}"] = jax.random.uniform(
            k, (fan_in, fan_out), dtype=jnp.float32, minval=-bound, maxval=bound
        )
        params[f"b{i}"] = jnp.zeros((1, fan_out), dtype=jnp.float32)  # 2D for VMEM layout
    return params


if __name__ == "__main__":
    key = jax.random.PRNGKey(0)
    k_param, k_x = jax.random.split(key)

    embedding_dim = 32
    num_crisis_types = 8
    batch = 10  # deliberately not a multiple of 8: exercises pad + slice path

    params = init_params(k_param, embedding_dim, num_crisis_types)
    x = jax.random.normal(k_x, (batch, embedding_dim), dtype=jnp.float32)

    fwd = jax.jit(crisis_classifier_forward)
    logits = fwd(x, params)
    jax.block_until_ready(logits)

    # Reference in plain JAX with the same bf16-input / f32-accumulate arithmetic.
    xb = x.astype(jnp.bfloat16)
    w1b = params["w1"].astype(jnp.bfloat16)
    w2b = params["w2"].astype(jnp.bfloat16)
    w3b = params["w3"].astype(jnp.bfloat16)
    h1 = jnp.maximum(
        jnp.dot(xb, w1b, preferred_element_type=jnp.float32) + params["b1"], 0.0)
    h2 = jnp.maximum(
        jnp.dot(h1.astype(jnp.bfloat16), w2b, preferred_element_type=jnp.float32)
        + params["b2"], 0.0)
    ref = (jnp.dot(h2.astype(jnp.bfloat16), w3b, preferred_element_type=jnp.float32)
           + params["b3"])

    assert logits.shape == (batch, num_crisis_types)
    assert jnp.allclose(logits, ref, atol=2e-3, rtol=2e-3)

    print("KERNEL_OK")
</pallas_src>

<mosaic_0001>
module attributes {stable_mosaic.version = 11 : i64} {
  func.func @_mlp_kernel(%arg0: i32, %arg1: memref<16x32xbf16, #tpu.memory_space<vmem>>, %arg2: memref<32x64xbf16, #tpu.memory_space<vmem>>, %arg3: memref<1x64xf32, #tpu.memory_space<vmem>>, %arg4: memref<64x32xbf16, #tpu.memory_space<vmem>>, %arg5: memref<1x32xf32, #tpu.memory_space<vmem>>, %arg6: memref<32x128xbf16, #tpu.memory_space<vmem>>, %arg7: memref<1x128xf32, #tpu.memory_space<vmem>>, %arg8: memref<16x128xf32, #tpu.memory_space<vmem>>) attributes {dimension_semantics = [#tpu.dimension_semantics<parallel>], iteration_bounds = array<i64: 1>, scalar_prefetch = 0 : i64, scratch_operands = 0 : i64, tpu.core_type = #tpu.core_type<tc>, window_params = [{transform_indices = @transform_0, window_bounds = array<i64: 16, 32>}, {pipeline_mode = #tpu.pipeline_mode<synchronous>, transform_indices = @transform_1, window_bounds = array<i64: 32, 64>}, {pipeline_mode = #tpu.pipeline_mode<synchronous>, transform_indices = @transform_2, window_bounds = array<i64: 1, 64>}, {pipeline_mode = #tpu.pipeline_mode<synchronous>, transform_indices = @transform_3, window_bounds = array<i64: 64, 32>}, {pipeline_mode = #tpu.pipeline_mode<synchronous>, transform_indices = @transform_4, window_bounds = array<i64: 1, 32>}, {pipeline_mode = #tpu.pipeline_mode<synchronous>, transform_indices = @transform_5, window_bounds = array<i64: 32, 128>}, {pipeline_mode = #tpu.pipeline_mode<synchronous>, transform_indices = @transform_6, window_bounds = array<i64: 1, 128>}, {transform_indices = @transform_7, window_bounds = array<i64: 16, 128>}]} {
    %c0 = arith.constant 0 : index
    %c0_0 = arith.constant 0 : index
    %0 = vector.load %arg1[%c0, %c0_0] : memref<16x32xbf16, #tpu.memory_space<vmem>>, vector<16x32xbf16>
    %c0_1 = arith.constant 0 : index
    %c0_2 = arith.constant 0 : index
    %1 = vector.load %arg2[%c0_1, %c0_2] : memref<32x64xbf16, #tpu.memory_space<vmem>>, vector<32x64xbf16>
    %cst = arith.constant dense<0.000000e+00> : vector<16x64xf32>
    %2 = tpu.matmul %0, %1, %cst {dimension_numbers = #tpu.dot_dimension_numbers<[1], [0], [0], [1], [0, 0, 1, 1], [], []>} : vector<16x32xbf16>, vector<32x64xbf16>, vector<16x64xf32> -> vector<16x64xf32>
    %c0_3 = arith.constant 0 : index
    %c0_4 = arith.constant 0 : index
    %3 = vector.load %arg3[%c0_3, %c0_4] : memref<1x64xf32, #tpu.memory_space<vmem>>, vector<1x64xf32>
    %4 = vector.broadcast %3 : vector<1x64xf32> to vector<16x64xf32>
    %5 = arith.addf %2, %4 : vector<16x64xf32>
    %cst_5 = arith.constant 0.000000e+00 : f32
    %6 = vector.broadcast %cst_5 : f32 to vector<16x64xf32>
    %7 = arith.maximumf %5, %6 : vector<16x64xf32>
    %8 = arith.truncf %7 : vector<16x64xf32> to vector<16x64xbf16>
    %c0_6 = arith.constant 0 : index
    %c0_7 = arith.constant 0 : index
    %9 = vector.load %arg4[%c0_6, %c0_7] : memref<64x32xbf16, #tpu.memory_space<vmem>>, vector<64x32xbf16>
    %cst_8 = arith.constant dense<0.000000e+00> : vector<16x32xf32>
    %10 = tpu.matmul %8, %9, %cst_8 {dimension_numbers = #tpu.dot_dimension_numbers<[1], [0], [0], [1], [0, 0, 1, 1], [], []>} : vector<16x64xbf16>, vector<64x32xbf16>, vector<16x32xf32> -> vector<16x32xf32>
    %c0_9 = arith.constant 0 : index
    %c0_10 = arith.constant 0 : index
    %11 = vector.load %arg5[%c0_9, %c0_10] : memref<1x32xf32, #tpu.memory_space<vmem>>, vector<1x32xf32>
    %12 = vector.broadcast %11 : vector<1x32xf32> to vector<16x32xf32>
    %13 = arith.addf %10, %12 : vector<16x32xf32>
    %cst_11 = arith.constant 0.000000e+00 : f32
    %14 = vector.broadcast %cst_11 : f32 to vector<16x32xf32>
    %15 = arith.maximumf %13, %14 : vector<16x32xf32>
    %16 = arith.truncf %15 : vector<16x32xf32> to vector<16x32xbf16>
    %c0_12 = arith.constant 0 : index
    %c0_13 = arith.constant 0 : index
    %17 = vector.load %arg6[%c0_12, %c0_13] : memref<32x128xbf16, #tpu.memory_space<vmem>>, vector<32x128xbf16>
    %cst_14 = arith.constant dense<0.000000e+00> : vector<16x128xf32>
    %18 = tpu.matmul %16, %17, %cst_14 {dimension_numbers = #tpu.dot_dimension_numbers<[1], [0], [0], [1], [0, 0, 1, 1], [], []>} : vector<16x32xbf16>, vector<32x128xbf16>, vector<16x128xf32> -> vector<16x128xf32>
    %c0_15 = arith.constant 0 : index
    %c0_16 = arith.constant 0 : index
    %19 = vector.load %arg7[%c0_15, %c0_16] : memref<1x128xf32, #tpu.memory_space<vmem>>, vector<1x128xf32>
    %20 = vector.broadcast %19 : vector<1x128xf32> to vector<16x128xf32>
    %21 = arith.addf %18, %20 : vector<16x128xf32>
    %c0_17 = arith.constant 0 : index
    %c0_18 = arith.constant 0 : index
    %22 = vector.load %arg8[%c0_17, %c0_18] : memref<16x128xf32, #tpu.memory_space<vmem>>, vector<16x128xf32>
    tpu.vector_store %arg8[%c0_17, %c0_18], %21 {strides = array<i32>} : memref<16x128xf32, #tpu.memory_space<vmem>>, vector<16x128xf32>,
    return
  }
  func.func @transform_0(%arg0: i32) -> (i32, i32) {
    %c0_i32 = arith.constant 0 : i32
    %c0_i32_0 = arith.constant 0 : i32
    return %arg0, %c0_i32 : i32, i32
  }
  func.func @transform_1(%arg0: i32) -> (i32, i32) {
    %c0_i32 = arith.constant 0 : i32
    %c0_i32_0 = arith.constant 0 : i32
    %c0_i32_1 = arith.constant 0 : i32
    return %c0_i32, %c0_i32_0 : i32, i32
  }
  func.func @transform_2(%arg0: i32) -> (i32, i32) {
    %c0_i32 = arith.constant 0 : i32
    %c0_i32_0 = arith.constant 0 : i32
    %c0_i32_1 = arith.constant 0 : i32
    return %c0_i32, %c0_i32_0 : i32, i32
  }
  func.func @transform_3(%arg0: i32) -> (i32, i32) {
    %c0_i32 = arith.constant 0 : i32
    %c0_i32_0 = arith.constant 0 : i32
    %c0_i32_1 = arith.constant 0 : i32
    return %c0_i32, %c0_i32_0 : i32, i32
  }
  func.func @transform_4(%arg0: i32) -> (i32, i32) {
    %c0_i32 = arith.constant 0 : i32
    %c0_i32_0 = arith.constant 0 : i32
    %c0_i32_1 = arith.constant 0 : i32
    return %c0_i32, %c0_i32_0 : i32, i32
  }
  func.func @transform_5(%arg0: i32) -> (i32, i32) {
    %c0_i32 = arith.constant 0 : i32
    %c0_i32_0 = arith.constant 0 : i32
    %c0_i32_1 = arith.constant 0 : i32
    return %c0_i32, %c0_i32_0 : i32, i32
  }
  func.func @transform_6(%arg0: i32) -> (i32, i32) {
    %c0_i32 = arith.constant 0 : i32
    %c0_i32_0 = arith.constant 0 : i32
    %c0_i32_1 = arith.constant 0 : i32
    return %c0_i32, %c0_i32_0 : i32, i32
  }
  func.func @transform_7(%arg0: i32) -> (i32, i32) {
    %c0_i32 = arith.constant 0 : i32
    %c0_i32_0 = arith.constant 0 : i32
    return %arg0, %c0_i32 : i32, i32
  }
}

</mosaic_0001>

<bundles_post_ra>
// kernel: crisis_classifier_forward.1
= control target key start
LH: loop header
LB: loop body
LE: loop exit
PB: predicated region body
PF: predicated region fallthrough
CT: control target
= control target key end

     0   :  { %v330_v0 = vmov 0.0   ;;  %vm331_vm0 = vmmov 0   ;;  %vm57_vm1 = vcmask 261120   ;;  %vm144_vm2 = vcmask 523264   ;;  %s419_s1 = inlined_call_operand.vmem [shape: bf16[32,64], index: 1, kind: input, shape index: {}]   ;;  %s420_s3 = inlined_call_operand.vmem [shape: bf16[64,32], index: 3, kind: input, shape index: {}]   ;;  %s421_s0 = inlined_call_operand.vmem [shape: bf16[16,32], index: 0, kind: input, shape index: {}]   ;;  %s422_s2 = inlined_call_operand.vmem [shape: f32[1,64], index: 2, kind: input, shape index: {}]   ;;  %s423_s5 = inlined_call_operand.vmem [shape: bf16[32,128], index: 5, kind: input, shape index: {}]   ;;  %s424_s4 = inlined_call_operand.vmem [shape: f32[1,32], index: 4, kind: input, shape index: {}]   ;;  %s425_s6 = inlined_call_operand.vmem [shape: f32[1,128], index: 6, kind: input, shape index: {}]   ;;  %s426_s7 = inlined_call_operand.vmem [shape: f32[16,128], index: 7, kind: output, shape index: {}]  }
   0x1   :  { %291 = vmatprep.subr.bf16.mxu0 %v330_v0  ;;  %v321_v1 = vld [vmem:[%s419_s1 + $0x8] sm:$0xff]   ;;  %295 = vmatprep.mubr.msk.bf16.mxu0 %vm331_vm0, %v330_v0  ;;  %v322_v2 = vld [vmem:[%s419_s1] sm:$0xff]   ;;  %v324_v3 = vld [vmem:[%s420_s3 + $0x18] sm:$0xff]  }
   0x2   :  { %299 = vmatprep.subr.bf16.mxu1 %v330_v0  ;;  %307 = vmatprep.mubr.msk.bf16.mxu1 %vm331_vm0, %v330_v0  ;;  %v323_v4 = vld [vmem:[%s421_s0] sm:$0xff]   ;;  %v325_v5 = vld [vmem:[%s420_s3 + $0x10] sm:$0xff]   ;;  %v326_v6 = vld [vmem:[%s420_s3 + $0x8] sm:$0xff]  }
   0x3   :  { %292 = vmatpush3.bf16.msra.mxu0 %v321_v1  ;;  %300 = vmatpush3.bf16.msra.mxu1 %v324_v3  ;;  %v327_v7 = vld [vmem:[%s420_s3] sm:$0xff]   ;;  %v328_v18 = vld [vmem:[%s423_s5 + $0x8] sm:$0xff]  }
   0x4   :  { %293 = vmatprep.subr.bf16.mxu0 %v330_v0  ;;  %301 = vmatprep.subr.bf16.mxu1 %v330_v0  ;;  %v265_v8 = vld [vmem:[%s422_s2] ss:$0 sm:$0xff] }
   0x5   :  { %v329_v19 = vld [vmem:[%s423_s5] sm:$0xff]  }
   0x6   :  { %v270_v20 = vld [vmem:[%s424_s4] ss:$0 sm:$0xff] }
   0x7   :  { %294 = vmatpush3.bf16.msra.mxu0 %v322_v2  ;;  %302 = vmatpush3.bf16.msra.mxu1 %v325_v5  ;;  %v276_v30 = vld [vmem:[%s425_s6] ss:$0 sm:$0xff] }
   0x8   :  { %311 = vmatprep.subr.bf16.mxu0 %v330_v0  ;;  %303 = vmatprep.subr.bf16.mxu1 %v330_v0 }
   0xa   :  { %296 = vmatmul.mubr.msk.bf16.vlgmr.msra.gmra.mxu0 %vm57_vm1, %v323_v4 }
   0xb   :  { %315 = vmatprep.mubr.msk.bf16.mxu0 %vm331_vm0, %v330_v0  ;;  %304 = vmatpush3.bf16.msra.mxu1 %v326_v6 }
   0xc   :  { %305 = vmatprep.subr.bf16.mxu1 %v330_v0  ;;  %312 = vmatpush3.bf16.msra.mxu0 %v328_v18 }
   0xd   :  { %313 = vmatprep.subr.bf16.mxu0 %v330_v0 }
   0xf   :  { %306 = vmatpush3.bf16.msra.mxu1 %v327_v7 }
  0x10   :  { %314 = vmatpush3.bf16.msra.mxu0 %v329_v19 }
  0xca   :  { %v95_v9 = vpop.f32.mrf.mxu0 }
  0xcb   :  { %v96_v11 = vadd.f32 %v265_v8, %v95_v9 }
  0xcc   :  { %v297_v10 = vpop.f32.mrf.mxu0 }
  0xcd   :  { %v102_v15 = vmax.f32 %v96_v11, 0.0 }
  0xce   :  { %v98_v12 = vpop.f32.mrf.mxu0 }
  0xcf   :  { %v99_v13 = vadd.f32 %v265_v8, %v98_v12 }
  0xd0   :  { %v298_v14 = vpop.f32.mrf.mxu0 }
  0xd1   :  { %v103_v16 = vmax.f32 %v99_v13, 0.0 }
  0xd3   :  { %v104_v17 = vpack.c.bf16 %v103_v16, %v102_v15 }
  0xd5   :  { %308 = vmatmul.mubr.msk.bf16.vlgmr.msra.gmra.mxu1 %vm144_vm2, %v104_v17 }
 0x195   :  { %v182_v21 = vpop.f32.mrf.mxu1 }
 0x196   :  { %v183_v23 = vadd.f32 %v270_v20, %v182_v21 }
 0x197   :  { %v309_v22 = vpop.f32.mrf.mxu1 }
 0x198   :  { %v189_v27 = vmax.f32 %v183_v23, 0.0 }
 0x199   :  { %v185_v24 = vpop.f32.mrf.mxu1 }
 0x19a   :  { %v186_v25 = vadd.f32 %v270_v20, %v185_v24 }
 0x19b   :  { %v310_v26 = vpop.f32.mrf.mxu1 }
 0x19c   :  { %v190_v28 = vmax.f32 %v186_v25, 0.0 }
 0x19e   :  { %v191_v29 = vpack.c.bf16 %v190_v28, %v189_v27 }
 0x1a0   :  { %316 = vmatmul.mubr.msk.bf16.vlgmr.msra.gmra.mxu0 %vm57_vm1, %v191_v29 }
 0x260   :  { %v252_v31 = vpop.f32.mrf.mxu0 }
 0x261   :  { %v253_v32 = vadd.f32 %v276_v30, %v252_v31 }
 0x262   :  { %v317_v33 = vpop.f32.mrf.mxu0 }
 0x263   :  { %259 = vst [vmem:[%s426_s7] sm:$0xff] %v253_v32 }
 0x264   :  { %v255_v34 = vpop.f32.mrf.mxu0 }
 0x265   :  { %v256_v35 = vadd.f32 %v276_v30, %v255_v34 }
 0x266   :  { %v318_v36 = vpop.f32.mrf.mxu0 }
 0x267   :  { %260 = vst [vmem:[%s426_s7 + $0x8] sm:$0xff] %v256_v35 }

</bundles_post_ra>
